<compile_context>
chip_gen: v7x
topology: tpu7x:2x2x1
jax: 0.10.0
libtpu: 0.0.40
codegen_flags: <defaults>
</compile_context>

<pallas_src>
import functools

import jax
import jax.numpy as jnp
from jax import lax
from jax.experimental import pallas as pl
from jax.experimental.pallas import tpu as pltpu

_LANE = 128      # vreg lane width
_SUBLANE = 8     # sublane granularity — batch tiles are multiples of this
_LN_EPS = 1e-5   # PyTorch nn.LayerNorm default


# ----------------------------------------------------------------------------
# Host-side helpers
# ----------------------------------------------------------------------------
def _round_up(x, m):
    return (x + m - 1) // m * m


def _feat_pad(dim):
    """Feature (lane) padding: 256-granule for wide dims (v6e/v7x 256x256 MXU),
    128 (one lane width) for narrow ones.  Both are legal on v5e."""
    return _round_up(dim, 256) if dim >= 256 else _round_up(dim, _LANE)


def _tpu_vmem_bytes():
    try:
        return int(pltpu.get_tpu_info().vmem_capacity_bytes)
    except Exception:
        return 64 * 2 ** 20          # conservative default (v7x per-TC size)


def _choose_tiling(batch, target_tm):
    """Pick (padded_batch, batch_tile): large tiles, bounded padding waste,
    and >=2 grid programs where possible (v7x megacore)."""
    b0 = _round_up(max(batch, _SUBLANE), _SUBLANE)
    max_waste = max(batch // 4, _SUBLANE)
    tm, b_pad = _SUBLANE, b0
    t = target_tm
    while t >= _SUBLANE:
        bp = _round_up(b0, t)
        if bp - b0 <= max_waste:
            tm, b_pad = t, bp
            break
        t //= 2
    while b_pad // tm < 2 and tm > _SUBLANE:
        tm //= 2
        b_pad = _round_up(b0, tm)
    return b_pad, tm


# ----------------------------------------------------------------------------
# Fused kernel
# ----------------------------------------------------------------------------
def _apply_activation(y, activation):
    if activation == "relu":
        return jnp.maximum(y, 0.0)
    if activation == "tanh":
        return jnp.tanh(y)
    if activation == "leakyrelu":
        return jnp.where(y >= 0.0, y, 0.01 * y)   # PyTorch default slope
    if activation == "sigmoid":
        return jax.nn.sigmoid(y)
    if activation is None:
        return y
    raise NotImplementedError(activation)


def _mlp_fused_kernel(*refs, n_layers, activation, activate_final,
                      use_layer_norm, out_features, eps):
    """refs = (x, w0, b0, w1, b1, ..., [gamma, beta], out).

    Whole MLP for one (tm, F) batch tile.  Matmuls accumulate in f32 on the
    MXU; bias/activation/LayerNorm math is f32; inter-layer activations are
    kept in the (narrow) matmul dtype to halve live-intermediate footprint.
    """
    x_ref = refs[0]
    o_ref = refs[-1]

    y = x_ref[...]
    for k in range(n_layers):
        w = refs[1 + 2 * k][...]                         # (FinP, FoutP)
        b = refs[2 + 2 * k][...].astype(jnp.float32)     # (1, FoutP)
        acc = jnp.dot(y.astype(w.dtype), w,
                      preferred_element_type=jnp.float32) + b
        if (k != n_layers - 1) or activate_final:
            acc = _apply_activation(acc, activation)
        # Keep the final layer's result in f32 for LayerNorm / output cast.
        y = acc if k == n_layers - 1 else acc.astype(w.dtype)

    if use_layer_norm:
        gamma = refs[1 + 2 * n_layers][...].astype(jnp.float32)
        beta = refs[2 + 2 * n_layers][...].astype(jnp.float32)
        fpad = y.shape[-1]
        inv_n = 1.0 / out_features
        col = lax.broadcasted_iota(jnp.int32, (1, fpad), 1)
        mask = col < out_features                         # ignore padded lanes
        ym = jnp.where(mask, y, 0.0)
        s1 = jnp.sum(ym, axis=-1, keepdims=True)          # one-pass statistics
        s2 = jnp.sum(ym * ym, axis=-1, keepdims=True)
        mean = s1 * inv_n
        var = jnp.maximum(s2 * inv_n - mean * mean, 0.0)
        diff = jnp.where(mask, y - mean, 0.0)
        y = diff * lax.rsqrt(var + eps) * gamma + beta    # padded lanes -> 0

    o_ref[...] = y.astype(o_ref.dtype)


# ----------------------------------------------------------------------------
# Parameter init (mirrors nn.Linear / nn.LayerNorm defaults) and preparation
# ----------------------------------------------------------------------------
def init_mlp_params(key, width, layer_norm=False):
    """PyTorch-layout params: W is (out, in), uniform(+-1/sqrt(fan_in))."""
    width = [w for w in width if w > 0]
    assert len(width) >= 2, "Need at least one layer in the network!"
    params = {"linears": [], "layer_norm": None, "width": width}
    for k in range(len(width) - 1):
        fan_in, fan_out = width[k], width[k + 1]
        key, kw, kb = jax.random.split(key, 3)
        bound = 1.0 / jnp.sqrt(jnp.float32(fan_in))
        W = jax.random.uniform(kw, (fan_out, fan_in), jnp.float32, -bound, bound)
        b = jax.random.uniform(kb, (fan_out,), jnp.float32, -bound, bound)
        params["linears"].append((W, b))
    if layer_norm:
        params["layer_norm"] = (jnp.ones((width[-1],), jnp.float32),
                                jnp.zeros((width[-1],), jnp.float32))
    return params


def prepare_mlp_params(params, matmul_dtype=jnp.bfloat16):
    """One-time setup: transpose to (Fin, Fout), zero-pad features, cast."""
    widths = params["width"]
    pads = [_feat_pad(w) for w in widths]
    layers = []
    for (W, b), fin, fout, finp, foutp in zip(params["linears"], widths[:-1],
                                              widths[1:], pads[:-1], pads[1:]):
        w_t = W.T.astype(matmul_dtype)                                  # (fin, fout)
        w_pad = jnp.zeros((finp, foutp), matmul_dtype).at[:fin, :fout].set(w_t)
        b_pad = jnp.zeros((1, foutp), jnp.float32).at[0, :fout].set(b)
        layers.append((w_pad, b_pad))
    ln = None
    if params["layer_norm"] is not None:
        gamma, beta = params["layer_norm"]
        fl, flp = widths[-1], pads[-1]
        g_pad = jnp.zeros((1, flp), jnp.float32).at[0, :fl].set(gamma)
        bt_pad = jnp.zeros((1, flp), jnp.float32).at[0, :fl].set(beta)
        ln = (g_pad, bt_pad)
    return {"layers": layers, "layer_norm": ln, "widths": widths}


# ----------------------------------------------------------------------------
# Fused forward
# ----------------------------------------------------------------------------
def _const_spec(shape, use_buffered):
    """BlockSpec for a grid-invariant (resident) parameter block."""
    if use_buffered:
        try:
            return pl.BlockSpec(shape, lambda i: (0, 0),
                                pipeline_mode=pl.Buffered(1))
        except Exception:
            pass
    return pl.BlockSpec(shape, lambda i: (0, 0))


def mlp_forward(prep, x, activation="relu", activate_final=False, out_dtype=None):
    layers = prep["layers"]
    ln = prep["layer_norm"]
    widths = prep["widths"]
    n_layers = len(layers)

    B, F0 = x.shape
    assert F0 == widths[0], "input feature dim mismatch"
    compute_dtype = layers[0][0].dtype
    io_dtype = compute_dtype if compute_dtype == jnp.bfloat16 else x.dtype
    out_dtype = x.dtype if out_dtype is None else out_dtype

    f0_pad = layers[0][0].shape[0]
    flast_pad = layers[-1][0].shape[1]
    flast = widths[-1]
    max_fp = max([f0_pad] + [w.shape[1] for (w, _) in layers])

    # Generation-aware VMEM cap and batch-tile target.
    vmem_phys = _tpu_vmem_bytes()
    vmem_cap = min((vmem_phys * 3) // 4, 100 * 2 ** 20)     # ~48 MiB on v7x
    target_tm = 512 if vmem_phys >= 96 * 2 ** 20 else 256   # v5e/v6e vs v7x
    b_pad, tm = _choose_tiling(B, target_tm)

    x_p = jnp.zeros((b_pad, f0_pad), io_dtype).at[:B, :F0].set(x.astype(io_dtype))

    kernel = functools.partial(
        _mlp_fused_kernel,
        n_layers=n_layers,
        activation=activation,
        activate_final=activate_final,
        use_layer_norm=ln is not None,
        out_features=flast,
        eps=_LN_EPS,
    )

    def run(use_buffered):
        operands = [x_p]
        in_specs = [pl.BlockSpec((tm, f0_pad), lambda i: (i, 0))]
        for (w, b) in layers:
            operands += [w, b]
            in_specs += [_const_spec(w.shape, use_buffered),
                         _const_spec(b.shape, use_buffered)]
        if ln is not None:
            g, bt = ln
            operands += [g, bt]
            in_specs += [_const_spec(g.shape, use_buffered),
                         _const_spec(bt.shape, use_buffered)]

        # VMEM accounting: params x (1 or 2) buffers, x/out tiles at exactly
        # 2 buffers each, + 2 live (tm, max_fp) f32 intermediates.
        param_bytes = sum(int(a.size) * a.dtype.itemsize
                          for (w, b) in layers for a in (w, b))
        if ln is not None:
            param_bytes += sum(int(a.size) * a.dtype.itemsize for a in ln)
        need = ((1 if use_buffered else 2) * param_bytes
                + 2 * tm * f0_pad * jnp.dtype(io_dtype).itemsize
                + 2 * tm * flast_pad * jnp.dtype(out_dtype).itemsize
                + 2 * tm * max_fp * 4)
        vmem_limit = int(min(vmem_cap, max((need * 3) // 2 + (4 << 20), 16 << 20)))

        return pl.pallas_call(
            kernel,
            out_shape=jax.ShapeDtypeStruct((b_pad, flast_pad), out_dtype),
            grid=(b_pad // tm,),
            in_specs=in_specs,
            out_specs=pl.BlockSpec((tm, flast_pad), lambda i: (i, 0)),
            compiler_params=pltpu.CompilerParams(
                dimension_semantics=("parallel",),
                vmem_limit_bytes=vmem_limit),
        )(*operands)

    try:
        out_p = run(True)        # single-buffered resident params
    except Exception:
        out_p = run(False)       # fallback: default buffering

    return out_p[:B, :flast]


# ----------------------------------------------------------------------------
# Pure-JAX reference (f32) for correctness checking
# ----------------------------------------------------------------------------
def mlp_forward_ref(params, x, activation="relu", activate_final=False):
    n_layers = len(params["linears"])
    y = x
    for k, (W, b) in enumerate(params["linears"]):
        y = y @ W.T + b
        if k != n_layers - 1 or activate_final:
            if activation == "relu":
                y = jnp.maximum(y, 0.0)
            elif activation == "tanh":
                y = jnp.tanh(y)
            elif activation == "leakyrelu":
                y = jnp.where(y >= 0, y, 0.01 * y)
            elif activation == "sigmoid":
                y = jax.nn.sigmoid(y)
    if params["layer_norm"] is not None:
        gamma, beta = params["layer_norm"]
        mean = jnp.mean(y, axis=-1, keepdims=True)
        var = jnp.mean(jnp.square(y - mean), axis=-1, keepdims=True)
        y = (y - mean) * lax.rsqrt(var + _LN_EPS) * gamma + beta
    return y


if __name__ == "__main__":
    key = jax.random.PRNGKey(0)
    k_params, k_x, k_p2, k_x2 = jax.random.split(key, 4)

    # Config 1: MLP([16, 32, 32, 8]) + LayerNorm, relu, batch=8.
    width = [16, 32, 32, 8]
    batch = 8
    params = init_mlp_params(k_params, width, layer_norm=True)
    x = jax.random.normal(k_x, (batch, width[0]), jnp.float32)
    ref = mlp_forward_ref(params, x, activation="relu", activate_final=False)

    # f32-MXU path: tight tolerance vs reference.
    prep_f32 = prepare_mlp_params(params, matmul_dtype=jnp.float32)
    out_f32 = jax.block_until_ready(mlp_forward(prep_f32, x))
    assert out_f32.shape == (batch, width[-1])
    assert jnp.allclose(out_f32, ref, atol=1e-5, rtol=1e-5), "f32 mismatch vs reference"

    # Default bf16 fast path: bf16 operands/intermediates, f32 accumulate.
    prep_bf16 = prepare_mlp_params(params)
    out_bf16 = jax.block_until_ready(mlp_forward(prep_bf16, x))
    assert out_bf16.shape == (batch, width[-1])
    assert jnp.allclose(out_bf16, ref, atol=1e-1, rtol=1e-1), "bf16 mismatch vs reference"

    # Config 2: non-multiple-of-8 batch, tanh, activate_final=True, no LayerNorm.
    params2 = init_mlp_params(k_p2, [16, 32, 8], layer_norm=False)
    x2 = jax.random.normal(k_x2, (20, 16), jnp.float32)
    ref2 = mlp_forward_ref(params2, x2, activation="tanh", activate_final=True)
    out2 = jax.block_until_ready(
        mlp_forward(prepare_mlp_params(params2), x2,
                    activation="tanh", activate_final=True))
    assert out2.shape == (20, 8)
    assert jnp.allclose(out2, ref2, atol=5e-2, rtol=5e-2), "bf16 tanh mismatch vs reference"

    print("KERNEL_OK")
</pallas_src>

<mosaic_0001>
module attributes {stable_mosaic.version = 11 : i64} {
  func.func @_mlp_fused_kernel(%arg0: i32, %arg1: memref<8x128xf32, #tpu.memory_space<vmem>>, %arg2: memref<128x128xf32, #tpu.memory_space<vmem>>, %arg3: memref<1x128xf32, #tpu.memory_space<vmem>>, %arg4: memref<128x128xf32, #tpu.memory_space<vmem>>, %arg5: memref<1x128xf32, #tpu.memory_space<vmem>>, %arg6: memref<128x128xf32, #tpu.memory_space<vmem>>, %arg7: memref<1x128xf32, #tpu.memory_space<vmem>>, %arg8: memref<1x128xf32, #tpu.memory_space<vmem>>, %arg9: memref<1x128xf32, #tpu.memory_space<vmem>>, %arg10: memref<8x128xf32, #tpu.memory_space<vmem>>) attributes {dimension_semantics = [#tpu.dimension_semantics<parallel>], iteration_bounds = array<i64: 1>, scalar_prefetch = 0 : i64, scratch_operands = 0 : i64, tpu.core_type = #tpu.core_type<tc>, window_params = [{transform_indices = @transform_0, window_bounds = array<i64: 8, 128>}, {pipeline_mode = #tpu.pipeline_mode<synchronous>, transform_indices = @transform_1, window_bounds = array<i64: 128, 128>}, {pipeline_mode = #tpu.pipeline_mode<synchronous>, transform_indices = @transform_2, window_bounds = array<i64: 1, 128>}, {pipeline_mode = #tpu.pipeline_mode<synchronous>, transform_indices = @transform_3, window_bounds = array<i64: 128, 128>}, {pipeline_mode = #tpu.pipeline_mode<synchronous>, transform_indices = @transform_4, window_bounds = array<i64: 1, 128>}, {pipeline_mode = #tpu.pipeline_mode<synchronous>, transform_indices = @transform_5, window_bounds = array<i64: 128, 128>}, {pipeline_mode = #tpu.pipeline_mode<synchronous>, transform_indices = @transform_6, window_bounds = array<i64: 1, 128>}, {pipeline_mode = #tpu.pipeline_mode<synchronous>, transform_indices = @transform_7, window_bounds = array<i64: 1, 128>}, {pipeline_mode = #tpu.pipeline_mode<synchronous>, transform_indices = @transform_8, window_bounds = array<i64: 1, 128>}, {transform_indices = @transform_9, window_bounds = array<i64: 8, 128>}]} {
    %c0 = arith.constant 0 : index
    %c0_0 = arith.constant 0 : index
    %0 = vector.load %arg1[%c0, %c0_0] : memref<8x128xf32, #tpu.memory_space<vmem>>, vector<8x128xf32>
    %c0_1 = arith.constant 0 : index
    %c0_2 = arith.constant 0 : index
    %1 = vector.load %arg2[%c0_1, %c0_2] : memref<128x128xf32, #tpu.memory_space<vmem>>, vector<128x128xf32>
    %c0_3 = arith.constant 0 : index
    %c0_4 = arith.constant 0 : index
    %2 = vector.load %arg3[%c0_3, %c0_4] : memref<1x128xf32, #tpu.memory_space<vmem>>, vector<1x128xf32>
    %cst = arith.constant dense<0.000000e+00> : vector<8x128xf32>
    %3 = tpu.matmul %0, %1, %cst {dimension_numbers = #tpu.dot_dimension_numbers<[1], [0], [0], [1], [0, 0, 1, 1], [], []>} : vector<8x128xf32>, vector<128x128xf32>, vector<8x128xf32> -> vector<8x128xf32>
    %4 = vector.broadcast %2 : vector<1x128xf32> to vector<8x128xf32>
    %5 = arith.addf %3, %4 : vector<8x128xf32>
    %cst_5 = arith.constant 0.000000e+00 : f32
    %6 = vector.broadcast %cst_5 : f32 to vector<8x128xf32>
    %7 = arith.maximumf %5, %6 : vector<8x128xf32>
    %c0_6 = arith.constant 0 : index
    %c0_7 = arith.constant 0 : index
    %8 = vector.load %arg4[%c0_6, %c0_7] : memref<128x128xf32, #tpu.memory_space<vmem>>, vector<128x128xf32>
    %c0_8 = arith.constant 0 : index
    %c0_9 = arith.constant 0 : index
    %9 = vector.load %arg5[%c0_8, %c0_9] : memref<1x128xf32, #tpu.memory_space<vmem>>, vector<1x128xf32>
    %cst_10 = arith.constant dense<0.000000e+00> : vector<8x128xf32>
    %10 = tpu.matmul %7, %8, %cst_10 {dimension_numbers = #tpu.dot_dimension_numbers<[1], [0], [0], [1], [0, 0, 1, 1], [], []>} : vector<8x128xf32>, vector<128x128xf32>, vector<8x128xf32> -> vector<8x128xf32>
    %11 = vector.broadcast %9 : vector<1x128xf32> to vector<8x128xf32>
    %12 = arith.addf %10, %11 : vector<8x128xf32>
    %cst_11 = arith.constant 0.000000e+00 : f32
    %13 = vector.broadcast %cst_11 : f32 to vector<8x128xf32>
    %14 = arith.maximumf %12, %13 : vector<8x128xf32>
    %c0_12 = arith.constant 0 : index
    %c0_13 = arith.constant 0 : index
    %15 = vector.load %arg6[%c0_12, %c0_13] : memref<128x128xf32, #tpu.memory_space<vmem>>, vector<128x128xf32>
    %c0_14 = arith.constant 0 : index
    %c0_15 = arith.constant 0 : index
    %16 = vector.load %arg7[%c0_14, %c0_15] : memref<1x128xf32, #tpu.memory_space<vmem>>, vector<1x128xf32>
    %cst_16 = arith.constant dense<0.000000e+00> : vector<8x128xf32>
    %17 = tpu.matmul %14, %15, %cst_16 {dimension_numbers = #tpu.dot_dimension_numbers<[1], [0], [0], [1], [0, 0, 1, 1], [], []>} : vector<8x128xf32>, vector<128x128xf32>, vector<8x128xf32> -> vector<8x128xf32>
    %18 = vector.broadcast %16 : vector<1x128xf32> to vector<8x128xf32>
    %19 = arith.addf %17, %18 : vector<8x128xf32>
    %c0_17 = arith.constant 0 : index
    %c0_18 = arith.constant 0 : index
    %20 = vector.load %arg8[%c0_17, %c0_18] : memref<1x128xf32, #tpu.memory_space<vmem>>, vector<1x128xf32>
    %c0_19 = arith.constant 0 : index
    %c0_20 = arith.constant 0 : index
    %21 = vector.load %arg9[%c0_19, %c0_20] : memref<1x128xf32, #tpu.memory_space<vmem>>, vector<1x128xf32>
    %22 = tpu.iota {dimensions = array<i32: 1>} : vector<1x128xi32>
    %c8_i32 = arith.constant 8 : i32
    %23 = vector.broadcast %c8_i32 : i32 to vector<1x128xi32>
    %24 = arith.cmpi slt, %22, %23 : vector<1x128xi32>
    %cst_21 = arith.constant 0.000000e+00 : f32
    %25 = vector.shape_cast %24 : vector<1x128xi1> to vector<1x128xi1>
    %26 = vector.broadcast %25 : vector<1x128xi1> to vector<8x128xi1>
    %27 = vector.broadcast %cst_21 : f32 to vector<8x128xf32>
    %28 = arith.select %26, %19, %27 : vector<8x128xi1>, vector<8x128xf32>
    %cst_22 = arith.constant dense<0.000000e+00> : vector<8xf32>
    %29 = vector.multi_reduction <add>, %28, %cst_22 [1] : vector<8x128xf32> to vector<8xf32>
    %30 = vector.shape_cast %29 : vector<8xf32> to vector<8x1xf32>
    %31 = arith.mulf %28, %28 : vector<8x128xf32>
    %cst_23 = arith.constant dense<0.000000e+00> : vector<8xf32>
    %32 = vector.multi_reduction <add>, %31, %cst_23 [1] : vector<8x128xf32> to vector<8xf32>
    %33 = vector.shape_cast %32 : vector<8xf32> to vector<8x1xf32>
    %cst_24 = arith.constant 1.250000e-01 : f32
    %34 = vector.broadcast %cst_24 : f32 to vector<8x1xf32>
    %35 = arith.mulf %30, %34 : vector<8x1xf32>
    %cst_25 = arith.constant 1.250000e-01 : f32
    %36 = vector.broadcast %cst_25 : f32 to vector<8x1xf32>
    %37 = arith.mulf %33, %36 : vector<8x1xf32>
    %38 = arith.mulf %35, %35 : vector<8x1xf32>
    %39 = arith.subf %37, %38 : vector<8x1xf32>
    %cst_26 = arith.constant 0.000000e+00 : f32
    %40 = vector.broadcast %cst_26 : f32 to vector<8x1xf32>
    %41 = arith.maximumf %39, %40 : vector<8x1xf32>
    %42 = vector.broadcast %35 : vector<8x1xf32> to vector<8x128xf32>
    %43 = arith.subf %19, %42 : vector<8x128xf32>
    %cst_27 = arith.constant 0.000000e+00 : f32
    %44 = vector.shape_cast %24 : vector<1x128xi1> to vector<1x128xi1>
    %45 = vector.broadcast %44 : vector<1x128xi1> to vector<8x128xi1>
    %46 = vector.broadcast %cst_27 : f32 to vector<8x128xf32>
    %47 = arith.select %45, %43, %46 : vector<8x128xi1>, vector<8x128xf32>
    %cst_28 = arith.constant 9.99999974E-6 : f32
    %48 = vector.broadcast %cst_28 : f32 to vector<8x1xf32>
    %49 = arith.addf %41, %48 : vector<8x1xf32>
    %50 = math.rsqrt %49 : vector<8x1xf32>
    %51 = vector.broadcast %50 : vector<8x1xf32> to vector<8x128xf32>
    %52 = arith.mulf %47, %51 : vector<8x128xf32>
    %53 = vector.broadcast %20 : vector<1x128xf32> to vector<8x128xf32>
    %54 = arith.mulf %52, %53 : vector<8x128xf32>
    %55 = vector.broadcast %21 : vector<1x128xf32> to vector<8x128xf32>
    %56 = arith.addf %54, %55 : vector<8x128xf32>
    %c0_29 = arith.constant 0 : index
    %c0_30 = arith.constant 0 : index
    %57 = vector.load %arg10[%c0_29, %c0_30] : memref<8x128xf32, #tpu.memory_space<vmem>>, vector<8x128xf32>
    tpu.vector_store %arg10[%c0_29, %c0_30], %56 {strides = array<i32>} : memref<8x128xf32, #tpu.memory_space<vmem>>, vector<8x128xf32>,
    return
  }
  func.func @transform_0(%arg0: i32) -> (i32, i32) {
    %c0_i32 = arith.constant 0 : i32
    %c0_i32_0 = arith.constant 0 : i32
    return %arg0, %c0_i32 : i32, i32
  }
  func.func @transform_1(%arg0: i32) -> (i32, i32) {
    %c0_i32 = arith.constant 0 : i32
    %c0_i32_0 = arith.constant 0 : i32
    %c0_i32_1 = arith.constant 0 : i32
    return %c0_i32, %c0_i32_0 : i32, i32
  }
  func.func @transform_2(%arg0: i32) -> (i32, i32) {
    %c0_i32 = arith.constant 0 : i32
    %c0_i32_0 = arith.constant 0 : i32
    %c0_i32_1 = arith.constant 0 : i32
    return %c0_i32, %c0_i32_0 : i32, i32
  }
  func.func @transform_3(%arg0: i32) -> (i32, i32) {
    %c0_i32 = arith.constant 0 : i32
    %c0_i32_0 = arith.constant 0 : i32
    %c0_i32_1 = arith.constant 0 : i32
    return %c0_i32, %c0_i32_0 : i32, i32
  }
  func.func @transform_4(%arg0: i32) -> (i32, i32) {
    %c0_i32 = arith.constant 0 : i32
    %c0_i32_0 = arith.constant 0 : i32
    %c0_i32_1 = arith.constant 0 : i32
    return %c0_i32, %c0_i32_0 : i32, i32
  }
  func.func @transform_5(%arg0: i32) -> (i32, i32) {
    %c0_i32 = arith.constant 0 : i32
    %c0_i32_0 = arith.constant 0 : i32
    %c0_i32_1 = arith.constant 0 : i32
    return %c0_i32, %c0_i32_0 : i32, i32
  }
  func.func @transform_6(%arg0: i32) -> (i32, i32) {
    %c0_i32 = arith.constant 0 : i32
    %c0_i32_0 = arith.constant 0 : i32
    %c0_i32_1 = arith.constant 0 : i32
    return %c0_i32, %c0_i32_0 : i32, i32
  }
  func.func @transform_7(%arg0: i32) -> (i32, i32) {
    %c0_i32 = arith.constant 0 : i32
    %c0_i32_0 = arith.constant 0 : i32
    %c0_i32_1 = arith.constant 0 : i32
    return %c0_i32, %c0_i32_0 : i32, i32
  }
  func.func @transform_8(%arg0: i32) -> (i32, i32) {
    %c0_i32 = arith.constant 0 : i32
    %c0_i32_0 = arith.constant 0 : i32
    %c0_i32_1 = arith.constant 0 : i32
    return %c0_i32, %c0_i32_0 : i32, i32
  }
  func.func @transform_9(%arg0: i32) -> (i32, i32) {
    %c0_i32 = arith.constant 0 : i32
    %c0_i32_0 = arith.constant 0 : i32
    return %arg0, %c0_i32 : i32, i32
  }
}

module attributes {stable_mosaic.version = 11 : i64} {
  func.func @_mlp_fused_kernel(%arg0: i32, %arg1: memref<8x128xf32, #tpu.memory_space<vmem>>, %arg2: memref<128x128xf32, #tpu.memory_space<vmem>>, %arg3: memref<1x128xf32, #tpu.memory_space<vmem>>, %arg4: memref<128x128xf32, #tpu.memory_space<vmem>>, %arg5: memref<1x128xf32, #tpu.memory_space<vmem>>, %arg6: memref<128x128xf32, #tpu.memory_space<vmem>>, %arg7: memref<1x128xf32, #tpu.memory_space<vmem>>, %arg8: memref<1x128xf32, #tpu.memory_space<vmem>>, %arg9: memref<1x128xf32, #tpu.memory_space<vmem>>, %arg10: memref<8x128xf32, #tpu.memory_space<vmem>>) attributes {dimension_semantics = [#tpu.dimension_semantics<parallel>], iteration_bounds = array<i64: 1>, scalar_prefetch = 0 : i64, scratch_operands = 0 : i64, tpu.core_type = #tpu.core_type<tc>, window_params = [{transform_indices = @transform_0, window_bounds = array<i64: 8, 128>}, {pipeline_mode = #tpu.pipeline_mode<synchronous>, transform_indices = @transform_1, window_bounds = array<i64: 128, 128>}, {pipeline_mode = #tpu.pipeline_mode<synchronous>, transform_indices = @transform_2, window_bounds = array<i64: 1, 128>}, {pipeline_mode = #tpu.pipeline_mode<synchronous>, transform_indices = @transform_3, window_bounds = array<i64: 128, 128>}, {pipeline_mode = #tpu.pipeline_mode<synchronous>, transform_indices = @transform_4, window_bounds = array<i64: 1, 128>}, {pipeline_mode = #tpu.pipeline_mode<synchronous>, transform_indices = @transform_5, window_bounds = array<i64: 128, 128>}, {pipeline_mode = #tpu.pipeline_mode<synchronous>, transform_indices = @transform_6, window_bounds = array<i64: 1, 128>}, {pipeline_mode = #tpu.pipeline_mode<synchronous>, transform_indices = @transform_7, window_bounds = array<i64: 1, 128>}, {pipeline_mode = #tpu.pipeline_mode<synchronous>, transform_indices = @transform_8, window_bounds = array<i64: 1, 128>}, {transform_indices = @transform_9, window_bounds = array<i64: 8, 128>}]} {
    %c0 = arith.constant 0 : index
    %c0_0 = arith.constant 0 : index
    %0 = vector.load %arg1[%c0, %c0_0] : memref<8x128xf32, #tpu.memory_space<vmem>>, vector<8x128xf32>
    %c0_1 = arith.constant 0 : index
    %c0_2 = arith.constant 0 : index
    %1 = vector.load %arg2[%c0_1, %c0_2] : memref<128x128xf32, #tpu.memory_space<vmem>>, vector<128x128xf32>
    %c0_3 = arith.constant 0 : index
    %c0_4 = arith.constant 0 : index
    %2 = vector.load %arg3[%c0_3, %c0_4] : memref<1x128xf32, #tpu.memory_space<vmem>>, vector<1x128xf32>
    %cst = arith.constant dense<0.000000e+00> : vector<8x128xf32>
    %3 = tpu.matmul %0, %1, %cst {dimension_numbers = #tpu.dot_dimension_numbers<[1], [0], [0], [1], [0, 0, 1, 1], [], []>} : vector<8x128xf32>, vector<128x128xf32>, vector<8x128xf32> -> vector<8x128xf32>
    %4 = vector.broadcast %2 : vector<1x128xf32> to vector<8x128xf32>
    %5 = arith.addf %3, %4 : vector<8x128xf32>
    %cst_5 = arith.constant 0.000000e+00 : f32
    %6 = vector.broadcast %cst_5 : f32 to vector<8x128xf32>
    %7 = arith.maximumf %5, %6 : vector<8x128xf32>
    %c0_6 = arith.constant 0 : index
    %c0_7 = arith.constant 0 : index
    %8 = vector.load %arg4[%c0_6, %c0_7] : memref<128x128xf32, #tpu.memory_space<vmem>>, vector<128x128xf32>
    %c0_8 = arith.constant 0 : index
    %c0_9 = arith.constant 0 : index
    %9 = vector.load %arg5[%c0_8, %c0_9] : memref<1x128xf32, #tpu.memory_space<vmem>>, vector<1x128xf32>
    %cst_10 = arith.constant dense<0.000000e+00> : vector<8x128xf32>
    %10 = tpu.matmul %7, %8, %cst_10 {dimension_numbers = #tpu.dot_dimension_numbers<[1], [0], [0], [1], [0, 0, 1, 1], [], []>} : vector<8x128xf32>, vector<128x128xf32>, vector<8x128xf32> -> vector<8x128xf32>
    %11 = vector.broadcast %9 : vector<1x128xf32> to vector<8x128xf32>
    %12 = arith.addf %10, %11 : vector<8x128xf32>
    %cst_11 = arith.constant 0.000000e+00 : f32
    %13 = vector.broadcast %cst_11 : f32 to vector<8x128xf32>
    %14 = arith.maximumf %12, %13 : vector<8x128xf32>
    %c0_12 = arith.constant 0 : index
    %c0_13 = arith.constant 0 : index
    %15 = vector.load %arg6[%c0_12, %c0_13] : memref<128x128xf32, #tpu.memory_space<vmem>>, vector<128x128xf32>
    %c0_14 = arith.constant 0 : index
    %c0_15 = arith.constant 0 : index
    %16 = vector.load %arg7[%c0_14, %c0_15] : memref<1x128xf32, #tpu.memory_space<vmem>>, vector<1x128xf32>
    %cst_16 = arith.constant dense<0.000000e+00> : vector<8x128xf32>
    %17 = tpu.matmul %14, %15, %cst_16 {dimension_numbers = #tpu.dot_dimension_numbers<[1], [0], [0], [1], [0, 0, 1, 1], [], []>} : vector<8x128xf32>, vector<128x128xf32>, vector<8x128xf32> -> vector<8x128xf32>
    %18 = vector.broadcast %16 : vector<1x128xf32> to vector<8x128xf32>
    %19 = arith.addf %17, %18 : vector<8x128xf32>
    %c0_17 = arith.constant 0 : index
    %c0_18 = arith.constant 0 : index
    %20 = vector.load %arg8[%c0_17, %c0_18] : memref<1x128xf32, #tpu.memory_space<vmem>>, vector<1x128xf32>
    %c0_19 = arith.constant 0 : index
    %c0_20 = arith.constant 0 : index
    %21 = vector.load %arg9[%c0_19, %c0_20] : memref<1x128xf32, #tpu.memory_space<vmem>>, vector<1x128xf32>
    %22 = tpu.iota {dimensions = array<i32: 1>} : vector<1x128xi32>
    %c8_i32 = arith.constant 8 : i32
    %23 = vector.broadcast %c8_i32 : i32 to vector<1x128xi32>
    %24 = arith.cmpi slt, %22, %23 : vector<1x128xi32>
    %cst_21 = arith.constant 0.000000e+00 : f32
    %25 = vector.shape_cast %24 : vector<1x128xi1> to vector<1x128xi1>
    %26 = vector.broadcast %25 : vector<1x128xi1> to vector<8x128xi1>
    %27 = vector.broadcast %cst_21 : f32 to vector<8x128xf32>
    %28 = arith.select %26, %19, %27 : vector<8x128xi1>, vector<8x128xf32>
    %cst_22 = arith.constant dense<0.000000e+00> : vector<8xf32>
    %29 = vector.multi_reduction <add>, %28, %cst_22 [1] : vector<8x128xf32> to vector<8xf32>
    %30 = vector.shape_cast %29 : vector<8xf32> to vector<8x1xf32>
    %31 = arith.mulf %28, %28 : vector<8x128xf32>
    %cst_23 = arith.constant dense<0.000000e+00> : vector<8xf32>
    %32 = vector.multi_reduction <add>, %31, %cst_23 [1] : vector<8x128xf32> to vector<8xf32>
    %33 = vector.shape_cast %32 : vector<8xf32> to vector<8x1xf32>
    %cst_24 = arith.constant 1.250000e-01 : f32
    %34 = vector.broadcast %cst_24 : f32 to vector<8x1xf32>
    %35 = arith.mulf %30, %34 : vector<8x1xf32>
    %cst_25 = arith.constant 1.250000e-01 : f32
    %36 = vector.broadcast %cst_25 : f32 to vector<8x1xf32>
    %37 = arith.mulf %33, %36 : vector<8x1xf32>
    %38 = arith.mulf %35, %35 : vector<8x1xf32>
    %39 = arith.subf %37, %38 : vector<8x1xf32>
    %cst_26 = arith.constant 0.000000e+00 : f32
    %40 = vector.broadcast %cst_26 : f32 to vector<8x1xf32>
    %41 = arith.maximumf %39, %40 : vector<8x1xf32>
    %42 = vector.broadcast %35 : vector<8x1xf32> to vector<8x128xf32>
    %43 = arith.subf %19, %42 : vector<8x128xf32>
    %cst_27 = arith.constant 0.000000e+00 : f32
    %44 = vector.shape_cast %24 : vector<1x128xi1> to vector<1x128xi1>
    %45 = vector.broadcast %44 : vector<1x128xi1> to vector<8x128xi1>
    %46 = vector.broadcast %cst_27 : f32 to vector<8x128xf32>
    %47 = arith.select %45, %43, %46 : vector<8x128xi1>, vector<8x128xf32>
    %cst_28 = arith.constant 9.99999974E-6 : f32
    %48 = vector.broadcast %cst_28 : f32 to vector<8x1xf32>
    %49 = arith.addf %41, %48 : vector<8x1xf32>
    %50 = math.rsqrt %49 : vector<8x1xf32>
    %51 = vector.broadcast %50 : vector<8x1xf32> to vector<8x128xf32>
    %52 = arith.mulf %47, %51 : vector<8x128xf32>
    %53 = vector.broadcast %20 : vector<1x128xf32> to vector<8x128xf32>
    %54 = arith.mulf %52, %53 : vector<8x128xf32>
    %55 = vector.broadcast %21 : vector<1x128xf32> to vector<8x128xf32>
    %56 = arith.addf %54, %55 : vector<8x128xf32>
    %c0_29 = arith.constant 0 : index
    %c0_30 = arith.constant 0 : index
    %57 = vector.load %arg10[%c0_29, %c0_30] : memref<8x128xf32, #tpu.memory_space<vmem>>, vector<8x128xf32>
    tpu.vector_store %arg10[%c0_29, %c0_30], %56 {strides = array<i32>} : memref<8x128xf32, #tpu.memory_space<vmem>>, vector<8x128xf32>,
    return
  }
  func.func @transform_0(%arg0: i32) -> (i32, i32) {
    %c0_i32 = arith.constant 0 : i32
    %c0_i32_0 = arith.constant 0 : i32
    return %arg0, %c0_i32 : i32, i32
  }
  func.func @transform_1(%arg0: i32) -> (i32, i32) {
    %c0_i32 = arith.constant 0 : i32
    %c0_i32_0 = arith.constant 0 : i32
    %c0_i32_1 = arith.constant 0 : i32
    return %c0_i32, %c0_i32_0 : i32, i32
  }
  func.func @transform_2(%arg0: i32) -> (i32, i32) {
    %c0_i32 = arith.constant 0 : i32
    %c0_i32_0 = arith.constant 0 : i32
    %c0_i32_1 = arith.constant 0 : i32
    return %c0_i32, %c0_i32_0 : i32, i32
  }
  func.func @transform_3(%arg0: i32) -> (i32, i32) {
    %c0_i32 = arith.constant 0 : i32
    %c0_i32_0 = arith.constant 0 : i32
    %c0_i32_1 = arith.constant 0 : i32
    return %c0_i32, %c0_i32_0 : i32, i32
  }
  func.func @transform_4(%arg0: i32) -> (i32, i32) {
    %c0_i32 = arith.constant 0 : i32
    %c0_i32_0 = arith.constant 0 : i32
    %c0_i32_1 = arith.constant 0 : i32
    return %c0_i32, %c0_i32_0 : i32, i32
  }
  func.func @transform_5(%arg0: i32) -> (i32, i32) {
    %c0_i32 = arith.constant 0 : i32
    %c0_i32_0 = arith.constant 0 : i32
    %c0_i32_1 = arith.constant 0 : i32
    return %c0_i32, %c0_i32_0 : i32, i32
  }
  func.func @transform_6(%arg0: i32) -> (i32, i32) {
    %c0_i32 = arith.constant 0 : i32
    %c0_i32_0 = arith.constant 0 : i32
    %c0_i32_1 = arith.constant 0 : i32
    return %c0_i32, %c0_i32_0 : i32, i32
  }
  func.func @transform_7(%arg0: i32) -> (i32, i32) {
    %c0_i32 = arith.constant 0 : i32
    %c0_i32_0 = arith.constant 0 : i32
    %c0_i32_1 = arith.constant 0 : i32
    return %c0_i32, %c0_i32_0 : i32, i32
  }
  func.func @transform_8(%arg0: i32) -> (i32, i32) {
    %c0_i32 = arith.constant 0 : i32
    %c0_i32_0 = arith.constant 0 : i32
    %c0_i32_1 = arith.constant 0 : i32
    return %c0_i32, %c0_i32_0 : i32, i32
  }
  func.func @transform_9(%arg0: i32) -> (i32, i32) {
    %c0_i32 = arith.constant 0 : i32
    %c0_i32_0 = arith.constant 0 : i32
    return %arg0, %c0_i32 : i32, i32
  }
}

</mosaic_0001>

<bundles_post_ra>
// kernel: tpu_custom_call.1
= control target key start
LH: loop header
LB: loop body
LE: loop exit
PB: predicated region body
PF: predicated region fallthrough
CT: control target
= control target key end

     0   :  { %14 = vsyncpa [#allocation3], 0  ;;  %s962_s0 = inlined_call_operand.hbm [shape: f32[8,128], index: 0, kind: input, shape index: {}]   ;;  %s963_s1 = inlined_call_operand.hbm [shape: f32[128,128], index: 1, kind: input, shape index: {}]   ;;  %s964_s2 = inlined_call_operand.vmem [shape: f32[1,128], index: 2, kind: input, shape index: {}]   ;;  %s965_s3 = inlined_call_operand.hbm [shape: f32[128,128], index: 3, kind: input, shape index: {}]   ;;  %s966_s4 = inlined_call_operand.vmem [shape: f32[1,128], index: 4, kind: input, shape index: {}]   ;;  %s967_s5 = inlined_call_operand.hbm [shape: f32[128,128], index: 5, kind: input, shape index: {}]   ;;  %s968_s6 = inlined_call_operand.vmem [shape: f32[1,128], index: 6, kind: input, shape index: {}]   ;;  %s969_s7 = inlined_call_operand.vmem [shape: f32[1,128], index: 7, kind: input, shape index: {}]   ;;  %s970_s8 = inlined_call_operand.vmem [shape: f32[1,128], index: 8, kind: input, shape index: {}]   ;;  %s971_s9 = inlined_call_operand.hbm [shape: f32[8,128], index: 9, kind: output, shape index: {}]  }
   0x1   :  { %15 = vsyncpa [#allocation6], 0 }
   0x2   :  { %16 = vsyncpa [#allocation9], 0 }
   0x3   :  { %17 = vsyncpa [#allocation4], 0  ;;  %s786_s30 = smov [#allocation5]   ;;  %s668_s13 = scalar_lea.hbm %s963_s1, 2048 }
   0x4   :  { %s33_s10 = sshll.u32 %s786_s30, 4  ;;  %p669_p0 = scmp.ne.s32.totalorder %s963_s1, %s668_s13  ;;  %s34_s10 = int_to_ptr.vmem [resolvable:$true] %s33_s10 }
   0x5   :  { %p672_p1 = scmp.lt.u32.totalorder %s668_s13, %s963_s1 }
   0x7   :  { %p674_p2 = pnand %p672_p1, %p669_p0 }
   0x9   :  { %677 = shalt.err (!%p674_p2)
}
   0xa   :  { %s678_s18 = scalar_lea.vmem %s34_s10, 2048  ;;  %p683_p4 = scmp.lt.s32.totalorder %s34_s10, %s34_s10 }
   0xb   :  { %p679_p3 = scmp.ne.s32.totalorder %s34_s10, %s678_s18  ;;  %p684_p5 = scmp.lt.s32.totalorder %s678_s18, %s678_s18 }
   0xd   :  { %p685_p6 = por %p684_p5, %p683_p4 }
   0xf   :  { %p686_p7 = pnand %p685_p6, %p679_p3 }
  0x11   :  { %689 = shalt.err (!%p686_p7)
}
  0x12   :  { %s787_s19 = smov 128   ;;  %s788_s20 = smov 8  }
  0x13   :  { %39 = dma.hbm_to_vmem [thread:$0]  %s963_s1, 2048, %s34_s10, [#allocation6], %s787_s19, %s787_s19, %s788_s20  }
  0x14   :  { %s789_s23 = smov [#allocation2]   ;;  %s790_s25 = smov [#allocation7]  }
  0x15   :  { %s24_s24 = sshll.u32 %s789_s23, 4  ;;  %s47_s26 = sshll.u32 %s790_s25, 4  ;;  %s25_s24 = int_to_ptr.vmem [resolvable:$true] %s24_s24  ;;  %s48_s26 = int_to_ptr.vmem [resolvable:$true] %s47_s26 }
  0x16   :  { %s690_s29 = scalar_lea.hbm %s962_s0, 128 }
  0x17   :  { %p691_p8 = scmp.ne.s32.totalorder %s962_s0, %s690_s29  ;;  %p694_p9 = scmp.lt.u32.totalorder %s690_s29, %s962_s0 }
  0x19   :  { %p696_p10 = pnand %p694_p9, %p691_p8 }
  0x1b   :  { %699 = shalt.err (!%p696_p10)
}
  0x1c   :  { %s700_s1 = scalar_lea.vmem %s25_s24, 128  ;;  %p705_p12 = scmp.lt.s32.totalorder %s25_s24, %s25_s24 }
  0x1d   :  { %p701_p11 = scmp.ne.s32.totalorder %s25_s24, %s700_s1  ;;  %p706_p13 = scmp.lt.s32.totalorder %s700_s1, %s700_s1 }
  0x1f   :  { %p707_p0 = por %p706_p13, %p705_p12 }
  0x21   :  { %p708_p1 = pnand %p707_p0, %p701_p11 }
  0x23   :  { %711 = shalt.err (!%p708_p1)
}
  0x24   :  { %27 = dma.hbm_to_vmem [thread:$0]  %s962_s0, 128, %s25_s24, [#allocation3]  }
  0x25   :  { %s712_s17 = scalar_lea.hbm %s965_s3, 2048 }
  0x26   :  { %p713_p2 = scmp.ne.s32.totalorder %s965_s3, %s712_s17  ;;  %p716_p3 = scmp.lt.u32.totalorder %s712_s17, %s965_s3 }
  0x28   :  { %p718_p4 = pnand %p716_p3, %p713_p2 }
  0x2a   :  { %721 = shalt.err (!%p718_p4)
}
  0x2b   :  { %s722_s25 = scalar_lea.vmem %s48_s26, 2048  ;;  %p727_p6 = scmp.lt.s32.totalorder %s48_s26, %s48_s26 }
  0x2c   :  { %p723_p5 = scmp.ne.s32.totalorder %s48_s26, %s722_s25  ;;  %p728_p7 = scmp.lt.s32.totalorder %s722_s25, %s722_s25 }
  0x2e   :  { %p729_p8 = por %p728_p7, %p727_p6 }
  0x30   :  { %p730_p9 = pnand %p729_p8, %p723_p5 }
  0x32   :  { %733 = shalt.err (!%p730_p9)
}
  0x33   :  { %53 = dma.hbm_to_vmem [thread:$0]  %s965_s3, 2048, %s48_s26, [#allocation6], %s787_s19, %s787_s19, %s788_s20  }
  0x34   :  { %s791_s27 = smov [#allocation8]   ;;  %s734_s11 = scalar_lea.hbm %s967_s5, 2048 }
  0x35   :  { %s61_s28 = sshll.u32 %s791_s27, 4  ;;  %p735_p10 = scmp.ne.s32.totalorder %s967_s5, %s734_s11  ;;  %s62_s28 = int_to_ptr.vmem [resolvable:$true] %s61_s28 }
  0x36   :  { %p738_p11 = scmp.lt.u32.totalorder %s734_s11, %s967_s5 }
  0x38   :  { %p740_p12 = pnand %p738_p11, %p735_p10 }
  0x3a   :  { %743 = shalt.err (!%p740_p12)
}
  0x3b   :  { %s744_s14 = scalar_lea.vmem %s62_s28, 2048  ;;  %p749_p0 = scmp.lt.s32.totalorder %s62_s28, %s62_s28 }
  0x3c   :  { %p745_p13 = scmp.ne.s32.totalorder %s62_s28, %s744_s14  ;;  %p750_p1 = scmp.lt.s32.totalorder %s744_s14, %s744_s14 }
  0x3e   :  { %p751_p2 = por %p750_p1, %p749_p0 }
  0x40   :  { %p752_p3 = pnand %p751_p2, %p745_p13 }
  0x42   :  { %755 = shalt.err (!%p752_p3)
}
  0x43   :  { %67 = dma.hbm_to_vmem [thread:$0]  %s967_s5, 2048, %s62_s28, [#allocation9], %s787_s19, %s787_s19, %s788_s20  }
  0x44   :  { %778 = dma.done.wait [#allocation3], 128  }
  0x45   :  { %779 = vsyncadd [#allocation3], 4294967168 }
  0x46   :  { %780 = dma.done.wait [#allocation6], 4096  }
  0x47   :  { %781 = vsyncadd [#allocation6], 4294963200 }
  0x48   :  { %782 = dma.done.wait [#allocation9], 2048  }
  0x49   :  { %783 = vsyncadd [#allocation9], 4294965248  ;;  %v792_v0 = vmov 0.0|0.0   ;;  %vm793_vm0 = vmmov 0   ;;  %v794_v1 = vmov 0.0   ;;  %v87_v2 = vld [vmem:[#allocation5] sm:$0xff] }
  0x4a   :  { %584 = vmatprep.subr.bf16.mxu0 %v792_v0  ;;  %511 = vmatprep.mubr.msk.f32.mxu0 %vm793_vm0, %v794_v1  ;;  %v88_v3 = vld [vmem:[#allocation5 + $0x8] sm:$0xff]  ;;  %v89_v4 = vld [vmem:[#allocation5 + $0x10] sm:$0xff]  ;;  %v90_v6 = vld [vmem:[#allocation5 + $0x18] sm:$0xff]  ;;  %s795_s21 = smov [#allocation10]  }
  0x4b   :  { %608 = vmatprep.subr.bf16.mxu1 %v792_v0  ;;  %546 = vmatprep.mubr.msk.f32.mxu1 %vm793_vm0, %v794_v1  ;;  %v585_v5 = vpack.c.bf16 %v88_v3, %v87_v2  ;;  %v588_v7 = vpack.c.bf16 %v90_v6, %v89_v4  ;;  %v91_v8 = vld [vmem:[#allocation5 + $0x20] sm:$0xff]  ;;  %v92_v9 = vld [vmem:[#allocation5 + $0x28] sm:$0xff]  ;;  %v183_v12 = vld [vmem:[#allocation7 + $0x10] sm:$0xff]  ;;  %s412_s22 = sshll.u32 %s795_s21, 4  ;;  %s413_s22 = int_to_ptr.vmem [resolvable:$true] %s412_s22 }
  0x4c   :  { %v181_v10 = vld [vmem:[#allocation7] sm:$0xff]  ;;  %v182_v11 = vld [vmem:[#allocation7 + $0x8] sm:$0xff]  ;;  %v184_v13 = vld [vmem:[#allocation7 + $0x18] sm:$0xff]  ;;  %v591_v14 = vpack.c.bf16 %v92_v9, %v91_v8  ;;  %s756_s23 = scalar_lea.vmem %s413_s22, 128  ;;  %p761_p5 = scmp.lt.s32.totalorder %s413_s22, %s413_s22 }
  0x4d   :  { %586 = vmatpush3.bf16.msra.mxu0 %v585_v5  ;;  %v609_v15 = vpack.c.bf16 %v182_v11, %v181_v10  ;;  %v93_v16 = vld [vmem:[#allocation5 + $0x30] sm:$0xff]  ;;  %v94_v17 = vld [vmem:[#allocation5 + $0x38] sm:$0xff]  ;;  %v612_v18 = vpack.c.bf16 %v184_v13, %v183_v12  ;;  %v185_v19 = vld [vmem:[#allocation7 + $0x20] sm:$0xff]  ;;  %p757_p4 = scmp.ne.s32.totalorder %s413_s22, %s756_s23  ;;  %p762_p6 = scmp.lt.s32.totalorder %s756_s23, %s756_s23 }
  0x4e   :  { %587 = vmatprep.subr.bf16.mxu0 %v792_v0  ;;  %v186_v20 = vld [vmem:[#allocation7 + $0x28] sm:$0xff]  ;;  %v594_v21 = vpack.c.bf16 %v94_v17, %v93_v16  ;;  %v95_v22 = vld [vmem:[#allocation5 + $0x40] sm:$0xff]  ;;  %v187_v25 = vld [vmem:[#allocation7 + $0x30] sm:$0xff] }
  0x4f   :  { %610 = vmatpush3.bf16.msra.mxu1 %v609_v15  ;;  %v96_v23 = vld [vmem:[#allocation5 + $0x48] sm:$0xff]  ;;  %v615_v24 = vpack.c.bf16 %v186_v20, %v185_v19  ;;  %v188_v26 = vld [vmem:[#allocation7 + $0x38] sm:$0xff]  ;;  %v97_v28 = vld [vmem:[#allocation5 + $0x50] sm:$0xff]  ;;  %p763_p7 = por %p762_p6, %p761_p5 }
  0x50   :  { %611 = vmatprep.subr.bf16.mxu1 %v792_v0  ;;  %v597_v27 = vpack.c.bf16 %v96_v23, %v95_v22  ;;  %v98_v29 = vld [vmem:[#allocation5 + $0x58] sm:$0xff]  ;;  %v618_v30 = vpack.c.bf16 %v188_v26, %v187_v25  ;;  %v189_v31 = vld [vmem:[#allocation7 + $0x40] sm:$0xff]  ;;  %v190_v32 = vld [vmem:[#allocation7 + $0x48] sm:$0xff] }
  0x51   :  { %589 = vmatpush3.bf16.msra.mxu0 %v588_v7  ;;  %v600_v33 = vpack.c.bf16 %v98_v29, %v97_v28  ;;  %v99_v34 = vld [vmem:[#allocation5 + $0x60] sm:$0xff]  ;;  %v100_v35 = vld [vmem:[#allocation5 + $0x68] sm:$0xff]  ;;  %v621_v36 = vpack.c.bf16 %v190_v32, %v189_v31  ;;  %v191_v37 = vld [vmem:[#allocation7 + $0x50] sm:$0xff]  ;;  %p764_p8 = pnand %p763_p7, %p757_p4 }
  0x52   :  { %590 = vmatprep.subr.bf16.mxu0 %v792_v0  ;;  %v192_v38 = vld [vmem:[#allocation7 + $0x58] sm:$0xff]  ;;  %v603_v39 = vpack.c.bf16 %v100_v35, %v99_v34  ;;  %v101_v40 = vld [vmem:[#allocation5 + $0x70] sm:$0xff]  ;;  %v193_v43 = vld [vmem:[#allocation7 + $0x60] sm:$0xff] }
  0x53   :  { %613 = vmatpush3.bf16.msra.mxu1 %v612_v18  ;;  %v102_v41 = vld [vmem:[#allocation5 + $0x78] sm:$0xff]  ;;  %v624_v42 = vpack.c.bf16 %v192_v38, %v191_v37  ;;  %v194_v44 = vld [vmem:[#allocation7 + $0x68] sm:$0xff]  ;;  %v195_v48 = vld [vmem:[#allocation7 + $0x70] sm:$0xff] }
  0x54   :  { %614 = vmatprep.subr.bf16.mxu1 %v792_v0  ;;  %v606_v45 = vpack.c.bf16 %v102_v41, %v101_v40  ;;  %v627_v46 = vpack.c.bf16 %v194_v44, %v193_v43  ;;  %v86_v47 = vld [vmem:[#allocation2] sm:$0xff]  ;;  %v275_v51 = vld [vmem:[#allocation8] sm:$0xff]  ;;  %v276_v52 = vld [vmem:[#allocation8 + $0x8] sm:$0xff] }
  0x55   :  { %592 = vmatpush3.bf16.msra.mxu0 %v591_v14  ;;  %v196_v49 = vld [vmem:[#allocation7 + $0x78] sm:$0xff]  ;;  %v277_v53 = vld [vmem:[#allocation8 + $0x10] sm:$0xff]  ;;  %v633_v54 = vpack.c.bf16 %v276_v52, %v275_v51  ;;  %v279_v57 = vld [vmem:[#allocation8 + $0x20] sm:$0xff] }
  0x56   :  { %593 = vmatprep.subr.bf16.mxu0 %v792_v0  ;;  %v630_v50 = vpack.c.bf16 %v196_v49, %v195_v48  ;;  %v278_v55 = vld [vmem:[#allocation8 + $0x18] sm:$0xff]  ;;  %v280_v58 = vld [vmem:[#allocation8 + $0x28] sm:$0xff]  ;;  %v281_v60 = vld [vmem:[#allocation8 + $0x30] sm:$0xff] }
  0x57   :  { %616 = vmatpush3.bf16.msra.mxu1 %v615_v24  ;;  %v636_v56 = vpack.c.bf16 %v278_v55, %v277_v53  ;;  %v639_v59 = vpack.c.bf16 %v280_v58, %v279_v57  ;;  %v282_v61 = vld [vmem:[#allocation8 + $0x38] sm:$0xff]  ;;  %v283_v63 = vld [vmem:[#allocation8 + $0x40] sm:$0xff]  ;;  %v285_v3 = vld [vmem:[#allocation8 + $0x50] sm:$0xff] }
  0x58   :  { %617 = vmatprep.subr.bf16.mxu1 %v792_v0  ;;  %v642_v62 = vpack.c.bf16 %v282_v61, %v281_v60  ;;  %v286_v4 = vld [vmem:[#allocation8 + $0x58] sm:$0xff]  ;;  %v287_v6 = vld [vmem:[#allocation8 + $0x60] sm:$0xff]  ;;  %v288_v7 = vld [vmem:[#allocation8 + $0x68] sm:$0xff] }
  0x59   :  { %595 = vmatpush3.bf16.msra.mxu0 %v594_v21  ;;  %v648_v5 = vpack.c.bf16 %v286_v4, %v285_v3  ;;  %v651_v8 = vpack.c.bf16 %v288_v7, %v287_v6  ;;  %v423_v9 = vld [vmem:[%s964_s2] ss:$0 sm:$0xff]  ;;  %v289_v14 = vld [vmem:[#allocation8 + $0x70] sm:$0xff]  ;;  %v370_v21 = vlaneseq }
  0x5a   :  { %596 = vmatprep.subr.bf16.mxu0 %v792_v0  ;;  %v290_v15 = vld [vmem:[#allocation8 + $0x78] sm:$0xff] }
  0x5b   :  { %619 = vmatpush3.bf16.msra.mxu1 %v618_v30  ;;  %v654_v16 = vpack.c.bf16 %v290_v15, %v289_v14  ;;  %v424_v17 = vld [vmem:[%s966_s4] ss:$0 sm:$0xff]  ;;  %v371_v22 = vand.u32 127, %v370_v21 }
  0x5c   :  { %620 = vmatprep.subr.bf16.mxu1 %v792_v0  ;;  %v425_v23 = vld [vmem:[%s968_s6] ss:$0 sm:$0xff] }
  0x5d   :  { %598 = vmatpush3.bf16.msra.mxu0 %v597_v27  ;;  %vm372_vm1 = vcmp.lt.s32.totalorder %v371_v22, 8  ;;  %v426_v40 = vld [vmem:[%s969_s7] ss:$0 sm:$0xff] }
  0x5e   :  { %599 = vmatprep.subr.bf16.mxu0 %v792_v0 }
  0x5f   :  { %622 = vmatpush3.bf16.msra.mxu1 %v621_v36 }
  0x60   :  { %623 = vmatprep.subr.bf16.mxu1 %v792_v0 }
  0x61   :  { %601 = vmatpush3.bf16.msra.mxu0 %v600_v33 }
  0x62   :  { %602 = vmatprep.subr.bf16.mxu0 %v792_v0 }
  0x63   :  { %625 = vmatpush3.bf16.msra.mxu1 %v624_v42  ;;  %v427_v42 = vld [vmem:[%s970_s8] ss:$0 sm:$0xff] }
  0x64   :  { %626 = vmatprep.subr.bf16.mxu1 %v792_v0 }
  0x65   :  { %604 = vmatpush3.bf16.msra.mxu0 %v603_v39 }
  0x66   :  { %605 = vmatprep.subr.bf16.mxu0 %v792_v0 }
  0x67   :  { %628 = vmatpush3.bf16.msra.mxu1 %v627_v46 }
  0x68   :  { %629 = vmatprep.subr.bf16.mxu1 %v792_v0 }
  0x69   :  { %607 = vmatpush3.bf16.msra.mxu0 %v606_v45 }
  0x6a   :  { %632 = vmatprep.subr.bf16.mxu0 %v792_v0 }
  0x6b   :  { %631 = vmatpush3.bf16.msra.mxu1 %v630_v50 }
  0x6c   :  { %512 = vmatmul.mubr.f32.vlgmr.msra.gmra.mrb[0].mxu0 %v86_v47 }
  0x6d   :  { %581 = vmatprep.mubr.msk.f32.mxu0 %vm793_vm0, %v794_v1  ;;  %634 = vmatpush3.bf16.msra.mxu0 %v633_v54  ;;  %v284_v1 = vld [vmem:[#allocation8 + $0x48] sm:$0xff] }
  0x6e   :  { %635 = vmatprep.subr.bf16.mxu0 %v792_v0  ;;  %v645_v2 = vpack.c.bf16 %v284_v1, %v283_v63 }
  0x71   :  { %637 = vmatpush3.bf16.msra.mxu0 %v636_v56 }
  0x72   :  { %638 = vmatprep.subr.bf16.mxu0 %v792_v0 }
  0x75   :  { %640 = vmatpush3.bf16.msra.mxu0 %v639_v59 }
  0x76   :  { %641 = vmatprep.subr.bf16.mxu0 %v792_v0 }
  0x79   :  { %643 = vmatpush3.bf16.msra.mxu0 %v642_v62 }
  0x7a   :  { %644 = vmatprep.subr.bf16.mxu0 %v792_v0 }
  0x7d   :  { %646 = vmatpush3.bf16.msra.mxu0 %v645_v2 }
  0x7e   :  { %647 = vmatprep.subr.bf16.mxu0 %v792_v0 }
  0x81   :  { %649 = vmatpush3.bf16.msra.mxu0 %v648_v5 }
  0x82   :  { %650 = vmatprep.subr.bf16.mxu0 %v792_v0 }
  0x85   :  { %652 = vmatpush3.bf16.msra.mxu0 %v651_v8 }
  0x86   :  { %653 = vmatprep.subr.bf16.mxu0 %v792_v0 }
  0x89   :  { %655 = vmatpush3.bf16.msra.mxu0 %v654_v16 }
 0x13f   :  { %v176_v10 = vpop.f32.mrb[0].mxu0 }
 0x140   :  { %v177_v11 = vadd.f32 %v423_v9, %v176_v10  ;;  %v513_v12 = vpop.f32.mrb[1].mxu0 }
 0x142   :  { %v180_v13 = vmax.f32 %v177_v11, 0.0 }
 0x144   :  { %547 = vmatmul.mubr.f32.vlgmr.msra.gmra.mrb[0].mxu1 %v180_v13 }
 0x217   :  { %v270_v18 = vpop.f32.mrb[0].mxu1 }
 0x218   :  { %v271_v19 = vadd.f32 %v424_v17, %v270_v18  ;;  %v548_v0 = vpop.f32.mrb[1].mxu1 }
 0x21a   :  { %v274_v20 = vmax.f32 %v271_v19, 0.0 }
 0x21c   :  { %582 = vmatmul.mubr.f32.vlgmr.msra.gmra.mrb[2].mxu0 %v274_v20 }
 0x2ef   :  { %v364_v24 = vpop.f32.mrb[2].mxu0 }
 0x2f0   :  { %v365_v25 = vadd.f32 %v425_v23, %v364_v24  ;;  %v583_v26 = vpop.f32.mrb[3].mxu0 }
 0x2f2   :  { %v375_v27 = vsel %vm372_vm1, %v365_v25, 0.0 }
 0x2f3   :  { %376 = vadd.xlane.f32.xlu0 %v375_v27  ;;  %v378_v28 = vmul.f32 %v375_v27, %v375_v27 }
 0x2f7   :  { %379 = vadd.xlane.f32.xlu0 %v378_v28 }
 0x380   :  { %v377_v29 = vpop.xlane.xlu0 %376 }
 0x381   :  { %v381_v30 = vmul.f32 0.125, %v377_v29 }
 0x383   :  { %v383_v32 = vmul.f32 %v381_v30, %v381_v30  ;;  %v386_v37 = vsub.f32 %v365_v25, %v381_v30 }
 0x384   :  { %v380_v31 = vpop.xlane.xlu0 %379 }
 0x385   :  { %v382_v33 = vmul.f32 0.125, %v380_v31  ;;  %v387_v39 = vsel %vm372_vm1, %v386_v37, 0.0 }
 0x387   :  { %v384_v34 = vsub.f32 %v382_v33, %v383_v32 }
 0x389   :  { %v385_v35 = vmax.f32 %v384_v34, 0.0 }
 0x38b   :  { %v388_v36 = vadd.f32 1e-05, %v385_v35 }
 0x38d   :  { %666 = vrsqrt.f32 %v388_v36 }
 0x397   :  { %v667_v38 = vpop.eup %666 }
 0x398   :  { %v390_v41 = vmul.f32 %v667_v38, %v387_v39 }
 0x39a   :  { %v397_v43 = vmul.f32 %v426_v40, %v390_v41 }
 0x39c   :  { %v404_v44 = vadd.f32 %v427_v42, %v397_v43 }
 0x39e   :  { %405 = vst [vmem:[#allocation10] sm:$0xff] %v404_v44 }
 0x39f   :  { %767 = shalt.err (!%p764_p8)
}
 0x3a0   :  { %s768_s0 = scalar_lea.hbm %s971_s9, 128 }
 0x3a1   :  { %p769_p9 = scmp.ne.s32.totalorder %s971_s9, %s768_s0  ;;  %p772_p10 = scmp.lt.u32.totalorder %s768_s0, %s971_s9 }
 0x3a3   :  { %p774_p11 = pnand %p772_p10, %p769_p9 }
 0x3a5   :  { %777 = shalt.err (!%p774_p11)
}
 0x3a6   :  { %415 = dma.vmem_to_hbm [thread:$0]  %s413_s22, 128, %s971_s9, [#allocation4]  }
 0x3a7   :  { %784 = dma.done.wait [#allocation4], 128  }
 0x3a8   :  { %785 = vsyncadd [#allocation4], 4294967168 }
 0x3a9   :  { %419 = vsyncpa [#allocation3], 1 }
 0x3aa   :  { %420 = vsyncpa [#allocation6], 1 }
 0x3ab   :  { %421 = vsyncpa [#allocation9], 1 }
 0x3ac   :  { %422 = vsyncpa [#allocation4], 1 }

// kernel: tpu_custom_call.1
= control target key start
LH: loop header
LB: loop body
LE: loop exit
PB: predicated region body
PF: predicated region fallthrough
CT: control target
= control target key end

     0   :  { %14 = vsyncpa [#allocation3], 0  ;;  %s962_s0 = inlined_call_operand.hbm [shape: f32[8,128], index: 0, kind: input, shape index: {}]   ;;  %s963_s1 = inlined_call_operand.hbm [shape: f32[128,128], index: 1, kind: input, shape index: {}]   ;;  %s964_s2 = inlined_call_operand.vmem [shape: f32[1,128], index: 2, kind: input, shape index: {}]   ;;  %s965_s3 = inlined_call_operand.hbm [shape: f32[128,128], index: 3, kind: input, shape index: {}]   ;;  %s966_s4 = inlined_call_operand.vmem [shape: f32[1,128], index: 4, kind: input, shape index: {}]   ;;  %s967_s5 = inlined_call_operand.hbm [shape: f32[128,128], index: 5, kind: input, shape index: {}]   ;;  %s968_s6 = inlined_call_operand.vmem [shape: f32[1,128], index: 6, kind: input, shape index: {}]   ;;  %s969_s7 = inlined_call_operand.vmem [shape: f32[1,128], index: 7, kind: input, shape index: {}]   ;;  %s970_s8 = inlined_call_operand.vmem [shape: f32[1,128], index: 8, kind: input, shape index: {}]   ;;  %s971_s9 = inlined_call_operand.hbm [shape: f32[8,128], index: 9, kind: output, shape index: {}]  }
   0x1   :  { %15 = vsyncpa [#allocation6], 0 }
   0x2   :  { %16 = vsyncpa [#allocation9], 0 }
   0x3   :  { %17 = vsyncpa [#allocation4], 0  ;;  %s786_s30 = smov [#allocation5]   ;;  %s668_s13 = scalar_lea.hbm %s963_s1, 2048 }
   0x4   :  { %s33_s10 = sshll.u32 %s786_s30, 4  ;;  %p669_p0 = scmp.ne.s32.totalorder %s963_s1, %s668_s13  ;;  %s34_s10 = int_to_ptr.vmem [resolvable:$true] %s33_s10 }
   0x5   :  { %p672_p1 = scmp.lt.u32.totalorder %s668_s13, %s963_s1 }
   0x7   :  { %p674_p2 = pnand %p672_p1, %p669_p0 }
   0x9   :  { %677 = shalt.err (!%p674_p2)
}
   0xa   :  { %s678_s18 = scalar_lea.vmem %s34_s10, 2048  ;;  %p683_p4 = scmp.lt.s32.totalorder %s34_s10, %s34_s10 }
   0xb   :  { %p679_p3 = scmp.ne.s32.totalorder %s34_s10, %s678_s18  ;;  %p684_p5 = scmp.lt.s32.totalorder %s678_s18, %s678_s18 }
   0xd   :  { %p685_p6 = por %p684_p5, %p683_p4 }
   0xf   :  { %p686_p7 = pnand %p685_p6, %p679_p3 }
  0x11   :  { %689 = shalt.err (!%p686_p7)
}
  0x12   :  { %s787_s19 = smov 128   ;;  %s788_s20 = smov 8  }
  0x13   :  { %39 = dma.hbm_to_vmem [thread:$0]  %s963_s1, 2048, %s34_s10, [#allocation6], %s787_s19, %s787_s19, %s788_s20  }
  0x14   :  { %s789_s23 = smov [#allocation2]   ;;  %s790_s25 = smov [#allocation7]  }
  0x15   :  { %s24_s24 = sshll.u32 %s789_s23, 4  ;;  %s47_s26 = sshll.u32 %s790_s25, 4  ;;  %s25_s24 = int_to_ptr.vmem [resolvable:$true] %s24_s24  ;;  %s48_s26 = int_to_ptr.vmem [resolvable:$true] %s47_s26 }
  0x16   :  { %s690_s29 = scalar_lea.hbm %s962_s0, 128 }
  0x17   :  { %p691_p8 = scmp.ne.s32.totalorder %s962_s0, %s690_s29  ;;  %p694_p9 = scmp.lt.u32.totalorder %s690_s29, %s962_s0 }
  0x19   :  { %p696_p10 = pnand %p694_p9, %p691_p8 }
  0x1b   :  { %699 = shalt.err (!%p696_p10)
}
  0x1c   :  { %s700_s1 = scalar_lea.vmem %s25_s24, 128  ;;  %p705_p12 = scmp.lt.s32.totalorder %s25_s24, %s25_s24 }
  0x1d   :  { %p701_p11 = scmp.ne.s32.totalorder %s25_s24, %s700_s1  ;;  %p706_p13 = scmp.lt.s32.totalorder %s700_s1, %s700_s1 }
  0x1f   :  { %p707_p0 = por %p706_p13, %p705_p12 }
  0x21   :  { %p708_p1 = pnand %p707_p0, %p701_p11 }
  0x23   :  { %711 = shalt.err (!%p708_p1)
}
  0x24   :  { %27 = dma.hbm_to_vmem [thread:$0]  %s962_s0, 128, %s25_s24, [#allocation3]  }
  0x25   :  { %s712_s17 = scalar_lea.hbm %s965_s3, 2048 }
  0x26   :  { %p713_p2 = scmp.ne.s32.totalorder %s965_s3, %s712_s17  ;;  %p716_p3 = scmp.lt.u32.totalorder %s712_s17, %s965_s3 }
  0x28   :  { %p718_p4 = pnand %p716_p3, %p713_p2 }
  0x2a   :  { %721 = shalt.err (!%p718_p4)
}
  0x2b   :  { %s722_s25 = scalar_lea.vmem %s48_s26, 2048  ;;  %p727_p6 = scmp.lt.s32.totalorder %s48_s26, %s48_s26 }
  0x2c   :  { %p723_p5 = scmp.ne.s32.totalorder %s48_s26, %s722_s25  ;;  %p728_p7 = scmp.lt.s32.totalorder %s722_s25, %s722_s25 }
  0x2e   :  { %p729_p8 = por %p728_p7, %p727_p6 }
  0x30   :  { %p730_p9 = pnand %p729_p8, %p723_p5 }
  0x32   :  { %733 = shalt.err (!%p730_p9)
}
  0x33   :  { %53 = dma.hbm_to_vmem [thread:$0]  %s965_s3, 2048, %s48_s26, [#allocation6], %s787_s19, %s787_s19, %s788_s20  }
  0x34   :  { %s791_s27 = smov [#allocation8]   ;;  %s734_s11 = scalar_lea.hbm %s967_s5, 2048 }
  0x35   :  { %s61_s28 = sshll.u32 %s791_s27, 4  ;;  %p735_p10 = scmp.ne.s32.totalorder %s967_s5, %s734_s11  ;;  %s62_s28 = int_to_ptr.vmem [resolvable:$true] %s61_s28 }
  0x36   :  { %p738_p11 = scmp.lt.u32.totalorder %s734_s11, %s967_s5 }
  0x38   :  { %p740_p12 = pnand %p738_p11, %p735_p10 }
  0x3a   :  { %743 = shalt.err (!%p740_p12)
}
  0x3b   :  { %s744_s14 = scalar_lea.vmem %s62_s28, 2048  ;;  %p749_p0 = scmp.lt.s32.totalorder %s62_s28, %s62_s28 }
  0x3c   :  { %p745_p13 = scmp.ne.s32.totalorder %s62_s28, %s744_s14  ;;  %p750_p1 = scmp.lt.s32.totalorder %s744_s14, %s744_s14 }
  0x3e   :  { %p751_p2 = por %p750_p1, %p749_p0 }
  0x40   :  { %p752_p3 = pnand %p751_p2, %p745_p13 }
  0x42   :  { %755 = shalt.err (!%p752_p3)
}
  0x43   :  { %67 = dma.hbm_to_vmem [thread:$0]  %s967_s5, 2048, %s62_s28, [#allocation9], %s787_s19, %s787_s19, %s788_s20  }
  0x44   :  { %778 = dma.done.wait [#allocation3], 128  }
  0x45   :  { %779 = vsyncadd [#allocation3], 4294967168 }
  0x46   :  { %780 = dma.done.wait [#allocation6], 4096  }
  0x47   :  { %781 = vsyncadd [#allocation6], 4294963200 }
  0x48   :  { %782 = dma.done.wait [#allocation9], 2048  }
  0x49   :  { %783 = vsyncadd [#allocation9], 4294965248  ;;  %v792_v0 = vmov 0.0|0.0   ;;  %vm793_vm0 = vmmov 0   ;;  %v794_v1 = vmov 0.0   ;;  %v87_v2 = vld [vmem:[#allocation5] sm:$0xff] }
  0x4a   :  { %584 = vmatprep.subr.bf16.mxu0 %v792_v0  ;;  %511 = vmatprep.mubr.msk.f32.mxu0 %vm793_vm0, %v794_v1  ;;  %v88_v3 = vld [vmem:[#allocation5 + $0x8] sm:$0xff]  ;;  %v89_v4 = vld [vmem:[#allocation5 + $0x10] sm:$0xff]  ;;  %v90_v6 = vld [vmem:[#allocation5 + $0x18] sm:$0xff]  ;;  %s795_s21 = smov [#allocation10]  }
  0x4b   :  { %608 = vmatprep.subr.bf16.mxu1 %v792_v0  ;;  %546 = vmatprep.mubr.msk.f32.mxu1 %vm793_vm0, %v794_v1  ;;  %v585_v5 = vpack.c.bf16 %v88_v3, %v87_v2  ;;  %v588_v7 = vpack.c.bf16 %v90_v6, %v89_v4  ;;  %v91_v8 = vld [vmem:[#allocation5 + $0x20] sm:$0xff]  ;;  %v92_v9 = vld [vmem:[#allocation5 + $0x28] sm:$0xff]  ;;  %v183_v12 = vld [vmem:[#allocation7 + $0x10] sm:$0xff]  ;;  %s412_s22 = sshll.u32 %s795_s21, 4  ;;  %s413_s22 = int_to_ptr.vmem [resolvable:$true] %s412_s22 }
  0x4c   :  { %v181_v10 = vld [vmem:[#allocation7] sm:$0xff]  ;;  %v182_v11 = vld [vmem:[#allocation7 + $0x8] sm:$0xff]  ;;  %v184_v13 = vld [vmem:[#allocation7 + $0x18] sm:$0xff]  ;;  %v591_v14 = vpack.c.bf16 %v92_v9, %v91_v8  ;;  %s756_s23 = scalar_lea.vmem %s413_s22, 128  ;;  %p761_p5 = scmp.lt.s32.totalorder %s413_s22, %s413_s22 }
  0x4d   :  { %586 = vmatpush3.bf16.msra.mxu0 %v585_v5  ;;  %v609_v15 = vpack.c.bf16 %v182_v11, %v181_v10  ;;  %v93_v16 = vld [vmem:[#allocation5 + $0x30] sm:$0xff]  ;;  %v94_v17 = vld [vmem:[#allocation5 + $0x38] sm:$0xff]  ;;  %v612_v18 = vpack.c.bf16 %v184_v13, %v183_v12  ;;  %v185_v19 = vld [vmem:[#allocation7 + $0x20] sm:$0xff]  ;;  %p757_p4 = scmp.ne.s32.totalorder %s413_s22, %s756_s23  ;;  %p762_p6 = scmp.lt.s32.totalorder %s756_s23, %s756_s23 }
  0x4e   :  { %587 = vmatprep.subr.bf16.mxu0 %v792_v0  ;;  %v186_v20 = vld [vmem:[#allocation7 + $0x28] sm:$0xff]  ;;  %v594_v21 = vpack.c.bf16 %v94_v17, %v93_v16  ;;  %v95_v22 = vld [vmem:[#allocation5 + $0x40] sm:$0xff]  ;;  %v187_v25 = vld [vmem:[#allocation7 + $0x30] sm:$0xff] }
  0x4f   :  { %610 = vmatpush3.bf16.msra.mxu1 %v609_v15  ;;  %v96_v23 = vld [vmem:[#allocation5 + $0x48] sm:$0xff]  ;;  %v615_v24 = vpack.c.bf16 %v186_v20, %v185_v19  ;;  %v188_v26 = vld [vmem:[#allocation7 + $0x38] sm:$0xff]  ;;  %v97_v28 = vld [vmem:[#allocation5 + $0x50] sm:$0xff]  ;;  %p763_p7 = por %p762_p6, %p761_p5 }
  0x50   :  { %611 = vmatprep.subr.bf16.mxu1 %v792_v0  ;;  %v597_v27 = vpack.c.bf16 %v96_v23, %v95_v22  ;;  %v98_v29 = vld [vmem:[#allocation5 + $0x58] sm:$0xff]  ;;  %v618_v30 = vpack.c.bf16 %v188_v26, %v187_v25  ;;  %v189_v31 = vld [vmem:[#allocation7 + $0x40] sm:$0xff]  ;;  %v190_v32 = vld [vmem:[#allocation7 + $0x48] sm:$0xff] }
  0x51   :  { %589 = vmatpush3.bf16.msra.mxu0 %v588_v7  ;;  %v600_v33 = vpack.c.bf16 %v98_v29, %v97_v28  ;;  %v99_v34 = vld [vmem:[#allocation5 + $0x60] sm:$0xff]  ;;  %v100_v35 = vld [vmem:[#allocation5 + $0x68] sm:$0xff]  ;;  %v621_v36 = vpack.c.bf16 %v190_v32, %v189_v31  ;;  %v191_v37 = vld [vmem:[#allocation7 + $0x50] sm:$0xff]  ;;  %p764_p8 = pnand %p763_p7, %p757_p4 }
  0x52   :  { %590 = vmatprep.subr.bf16.mxu0 %v792_v0  ;;  %v192_v38 = vld [vmem:[#allocation7 + $0x58] sm:$0xff]  ;;  %v603_v39 = vpack.c.bf16 %v100_v35, %v99_v34  ;;  %v101_v40 = vld [vmem:[#allocation5 + $0x70] sm:$0xff]  ;;  %v193_v43 = vld [vmem:[#allocation7 + $0x60] sm:$0xff] }
  0x53   :  { %613 = vmatpush3.bf16.msra.mxu1 %v612_v18  ;;  %v102_v41 = vld [vmem:[#allocation5 + $0x78] sm:$0xff]  ;;  %v624_v42 = vpack.c.bf16 %v192_v38, %v191_v37  ;;  %v194_v44 = vld [vmem:[#allocation7 + $0x68] sm:$0xff]  ;;  %v195_v48 = vld [vmem:[#allocation7 + $0x70] sm:$0xff] }
  0x54   :  { %614 = vmatprep.subr.bf16.mxu1 %v792_v0  ;;  %v606_v45 = vpack.c.bf16 %v102_v41, %v101_v40  ;;  %v627_v46 = vpack.c.bf16 %v194_v44, %v193_v43  ;;  %v86_v47 = vld [vmem:[#allocation2] sm:$0xff]  ;;  %v275_v51 = vld [vmem:[#allocation8] sm:$0xff]  ;;  %v276_v52 = vld [vmem:[#allocation8 + $0x8] sm:$0xff] }
  0x55   :  { %592 = vmatpush3.bf16.msra.mxu0 %v591_v14  ;;  %v196_v49 = vld [vmem:[#allocation7 + $0x78] sm:$0xff]  ;;  %v277_v53 = vld [vmem:[#allocation8 + $0x10] sm:$0xff]  ;;  %v633_v54 = vpack.c.bf16 %v276_v52, %v275_v51  ;;  %v279_v57 = vld [vmem:[#allocation8 + $0x20] sm:$0xff] }
  0x56   :  { %593 = vmatprep.subr.bf16.mxu0 %v792_v0  ;;  %v630_v50 = vpack.c.bf16 %v196_v49, %v195_v48  ;;  %v278_v55 = vld [vmem:[#allocation8 + $0x18] sm:$0xff]  ;;  %v280_v58 = vld [vmem:[#allocation8 + $0x28] sm:$0xff]  ;;  %v281_v60 = vld [vmem:[#allocation8 + $0x30] sm:$0xff] }
  0x57   :  { %616 = vmatpush3.bf16.msra.mxu1 %v615_v24  ;;  %v636_v56 = vpack.c.bf16 %v278_v55, %v277_v53  ;;  %v639_v59 = vpack.c.bf16 %v280_v58, %v279_v57  ;;  %v282_v61 = vld [vmem:[#allocation8 + $0x38] sm:$0xff]  ;;  %v283_v63 = vld [vmem:[#allocation8 + $0x40] sm:$0xff]  ;;  %v285_v3 = vld [vmem:[#allocation8 + $0x50] sm:$0xff] }
  0x58   :  { %617 = vmatprep.subr.bf16.mxu1 %v792_v0  ;;  %v642_v62 = vpack.c.bf16 %v282_v61, %v281_v60  ;;  %v286_v4 = vld [vmem:[#allocation8 + $0x58] sm:$0xff]  ;;  %v287_v6 = vld [vmem:[#allocation8 + $0x60] sm:$0xff]  ;;  %v288_v7 = vld [vmem:[#allocation8 + $0x68] sm:$0xff] }
  0x59   :  { %595 = vmatpush3.bf16.msra.mxu0 %v594_v21  ;;  %v648_v5 = vpack.c.bf16 %v286_v4, %v285_v3  ;;  %v651_v8 = vpack.c.bf16 %v288_v7, %v287_v6  ;;  %v423_v9 = vld [vmem:[%s964_s2] ss:$0 sm:$0xff]  ;;  %v289_v14 = vld [vmem:[#allocation8 + $0x70] sm:$0xff]  ;;  %v370_v21 = vlaneseq }
  0x5a   :  { %596 = vmatprep.subr.bf16.mxu0 %v792_v0  ;;  %v290_v15 = vld [vmem:[#allocation8 + $0x78] sm:$0xff] }
  0x5b   :  { %619 = vmatpush3.bf16.msra.mxu1 %v618_v30  ;;  %v654_v16 = vpack.c.bf16 %v290_v15, %v289_v14  ;;  %v424_v17 = vld [vmem:[%s966_s4] ss:$0 sm:$0xff]  ;;  %v371_v22 = vand.u32 127, %v370_v21 }
  0x5c   :  { %620 = vmatprep.subr.bf16.mxu1 %v792_v0  ;;  %v425_v23 = vld [vmem:[%s968_s6] ss:$0 sm:$0xff] }
  0x5d   :  { %598 = vmatpush3.bf16.msra.mxu0 %v597_v27  ;;  %vm372_vm1 = vcmp.lt.s32.totalorder %v371_v22, 8  ;;  %v426_v40 = vld [vmem:[%s969_s7] ss:$0 sm:$0xff] }
  0x5e   :  { %599 = vmatprep.subr.bf16.mxu0 %v792_v0 }
  0x5f   :  { %622 = vmatpush3.bf16.msra.mxu1 %v621_v36 }
  0x60   :  { %623 = vmatprep.subr.bf16.mxu1 %v792_v0 }
  0x61   :  { %601 = vmatpush3.bf16.msra.mxu0 %v600_v33 }
  0x62   :  { %602 = vmatprep.subr.bf16.mxu0 %v792_v0 }
  0x63   :  { %625 = vmatpush3.bf16.msra.mxu1 %v624_v42  ;;  %v427_v42 = vld [vmem:[%s970_s8] ss:$0 sm:$0xff] }
  0x64   :  { %626 = vmatprep.subr.bf16.mxu1 %v792_v0 }
  0x65   :  { %604 = vmatpush3.bf16.msra.mxu0 %v603_v39 }
  0x66   :  { %605 = vmatprep.subr.bf16.mxu0 %v792_v0 }
  0x67   :  { %628 = vmatpush3.bf16.msra.mxu1 %v627_v46 }
  0x68   :  { %629 = vmatprep.subr.bf16.mxu1 %v792_v0 }
  0x69   :  { %607 = vmatpush3.bf16.msra.mxu0 %v606_v45 }
  0x6a   :  { %632 = vmatprep.subr.bf16.mxu0 %v792_v0 }
  0x6b   :  { %631 = vmatpush3.bf16.msra.mxu1 %v630_v50 }
  0x6c   :  { %512 = vmatmul.mubr.f32.vlgmr.msra.gmra.mrb[0].mxu0 %v86_v47 }
  0x6d   :  { %581 = vmatprep.mubr.msk.f32.mxu0 %vm793_vm0, %v794_v1  ;;  %634 = vmatpush3.bf16.msra.mxu0 %v633_v54  ;;  %v284_v1 = vld [vmem:[#allocation8 + $0x48] sm:$0xff] }
  0x6e   :  { %635 = vmatprep.subr.bf16.mxu0 %v792_v0  ;;  %v645_v2 = vpack.c.bf16 %v284_v1, %v283_v63 }
  0x71   :  { %637 = vmatpush3.bf16.msra.mxu0 %v636_v56 }
  0x72   :  { %638 = vmatprep.subr.bf16.mxu0 %v792_v0 }
  0x75   :  { %640 = vmatpush3.bf16.msra.mxu0 %v639_v59 }
  0x76   :  { %641 = vmatprep.subr.bf16.mxu0 %v792_v0 }
  0x79   :  { %643 = vmatpush3.bf16.msra.mxu0 %v642_v62 }
  0x7a   :  { %644 = vmatprep.subr.bf16.mxu0 %v792_v0 }
  0x7d   :  { %646 = vmatpush3.bf16.msra.mxu0 %v645_v2 }
  0x7e   :  { %647 = vmatprep.subr.bf16.mxu0 %v792_v0 }
  0x81   :  { %649 = vmatpush3.bf16.msra.mxu0 %v648_v5 }
  0x82   :  { %650 = vmatprep.subr.bf16.mxu0 %v792_v0 }
  0x85   :  { %652 = vmatpush3.bf16.msra.mxu0 %v651_v8 }
  0x86   :  { %653 = vmatprep.subr.bf16.mxu0 %v792_v0 }
  0x89   :  { %655 = vmatpush3.bf16.msra.mxu0 %v654_v16 }
 0x13f   :  { %v176_v10 = vpop.f32.mrb[0].mxu0 }
 0x140   :  { %v177_v11 = vadd.f32 %v423_v9, %v176_v10  ;;  %v513_v12 = vpop.f32.mrb[1].mxu0 }
 0x142   :  { %v180_v13 = vmax.f32 %v177_v11, 0.0 }
 0x144   :  { %547 = vmatmul.mubr.f32.vlgmr.msra.gmra.mrb[0].mxu1 %v180_v13 }
 0x217   :  { %v270_v18 = vpop.f32.mrb[0].mxu1 }
 0x218   :  { %v271_v19 = vadd.f32 %v424_v17, %v270_v18  ;;  %v548_v0 = vpop.f32.mrb[1].mxu1 }
 0x21a   :  { %v274_v20 = vmax.f32 %v271_v19, 0.0 }
 0x21c   :  { %582 = vmatmul.mubr.f32.vlgmr.msra.gmra.mrb[2].mxu0 %v274_v20 }
 0x2ef   :  { %v364_v24 = vpop.f32.mrb[2].mxu0 }
 0x2f0   :  { %v365_v25 = vadd.f32 %v425_v23, %v364_v24  ;;  %v583_v26 = vpop.f32.mrb[3].mxu0 }
 0x2f2   :  { %v375_v27 = vsel %vm372_vm1, %v365_v25, 0.0 }
 0x2f3   :  { %376 = vadd.xlane.f32.xlu0 %v375_v27  ;;  %v378_v28 = vmul.f32 %v375_v27, %v375_v27 }
 0x2f7   :  { %379 = vadd.xlane.f32.xlu0 %v378_v28 }
 0x380   :  { %v377_v29 = vpop.xlane.xlu0 %376 }
 0x381   :  { %v381_v30 = vmul.f32 0.125, %v377_v29 }
 0x383   :  { %v383_v32 = vmul.f32 %v381_v30, %v381_v30  ;;  %v386_v37 = vsub.f32 %v365_v25, %v381_v30 }
 0x384   :  { %v380_v31 = vpop.xlane.xlu0 %379 }
 0x385   :  { %v382_v33 = vmul.f32 0.125, %v380_v31  ;;  %v387_v39 = vsel %vm372_vm1, %v386_v37, 0.0 }
 0x387   :  { %v384_v34 = vsub.f32 %v382_v33, %v383_v32 }
 0x389   :  { %v385_v35 = vmax.f32 %v384_v34, 0.0 }
 0x38b   :  { %v388_v36 = vadd.f32 1e-05, %v385_v35 }
 0x38d   :  { %666 = vrsqrt.f32 %v388_v36 }
 0x397   :  { %v667_v38 = vpop.eup %666 }
 0x398   :  { %v390_v41 = vmul.f32 %v667_v38, %v387_v39 }
 0x39a   :  { %v397_v43 = vmul.f32 %v426_v40, %v390_v41 }
 0x39c   :  { %v404_v44 = vadd.f32 %v427_v42, %v397_v43 }
 0x39e   :  { %405 = vst [vmem:[#allocation10] sm:$0xff] %v404_v44 }
 0x39f   :  { %767 = shalt.err (!%p764_p8)
}
 0x3a0   :  { %s768_s0 = scalar_lea.hbm %s971_s9, 128 }
 0x3a1   :  { %p769_p9 = scmp.ne.s32.totalorder %s971_s9, %s768_s0  ;;  %p772_p10 = scmp.lt.u32.totalorder %s768_s0, %s971_s9 }
 0x3a3   :  { %p774_p11 = pnand %p772_p10, %p769_p9 }
 0x3a5   :  { %777 = shalt.err (!%p774_p11)
}
 0x3a6   :  { %415 = dma.vmem_to_hbm [thread:$0]  %s413_s22, 128, %s971_s9, [#allocation4]  }
 0x3a7   :  { %784 = dma.done.wait [#allocation4], 128  }
 0x3a8   :  { %785 = vsyncadd [#allocation4], 4294967168 }
 0x3a9   :  { %419 = vsyncpa [#allocation3], 1 }
 0x3aa   :  { %420 = vsyncpa [#allocation6], 1 }
 0x3ab   :  { %421 = vsyncpa [#allocation9], 1 }
 0x3ac   :  { %422 = vsyncpa [#allocation4], 1 }

</bundles_post_ra>
